<compile_context>
chip_gen: v6e
topology: v6e:2x2x1
jax: 0.10.0
libtpu: 0.0.40
codegen_flags: <defaults>
</compile_context>

<pallas_src>
import functools

import jax
import jax.numpy as jnp
import numpy as np
from jax.experimental import pallas as pl
from jax.experimental.pallas import tpu as pltpu


def _vmem():
    return pl.BlockSpec(memory_space=pltpu.MemorySpace.VMEM)


# ----------------------------------------------------------------------------
# Fused decode-step kernel: attention + stacked-LSTM step + output projection
# ----------------------------------------------------------------------------
def fused_decoder_kernel(*refs, n_layers, hidden_size):
    n_fixed = 12
    n_layer_extra = 3 * (n_layers - 1)
    (emb_ref, hid_ref, cell_ref, enc_ref,
     w_hid_t, w_enc_bt, b_att, tanw,
     w_ih0e_t, w_ih0c_t, w_hh0_t, b_l0) = refs[:n_fixed]
    layer_refs = refs[n_fixed:n_fixed + n_layer_extra]
    w_out_t, b_out = refs[n_fixed + n_layer_extra:n_fixed + n_layer_extra + 2]
    logits_ref, h_out_ref, c_out_ref, att_last_ref = refs[n_fixed + n_layer_extra + 2:]

    f32 = jnp.float32
    bf16 = jnp.bfloat16
    B, S, H = enc_ref.shape

    # ---- additive attention: tanh(hid_lin(h_last) + enc_lin(enc)) -------------------
    hid_last = hid_ref[n_layers - 1]                       # (B, H)
    enc = enc_ref[...]                                     # (B, S, H) batch-first

    # hid_lin + (b_hid + b_enc) folded into one bias
    hid_proj = jnp.dot(hid_last.astype(bf16), w_hid_t[...],
                       preferred_element_type=f32) + b_att[...]          # (B, H)
    # enc_lin as a batched matmul (no in-kernel reshape): (B,S,H) x (B,H,H) -> (B,S,H)
    enc_proj = jnp.einsum('bsh,bhg->bsg', enc.astype(bf16), w_enc_bt[...],
                          preferred_element_type=f32)                    # (B, S, H)
    tan = jnp.tanh(hid_proj[:, None, :] + enc_proj)                      # (B, S, H)

    # bmm(tan, tan_weight).squeeze(2) == sum_h tan * tan_weight
    scores = jnp.sum(tan * tanw[...][:, None, :], axis=-1)               # (B, S)

    # softmax over the sequence dim (lanes); divide via EUP reciprocal
    m = jnp.max(scores, axis=-1, keepdims=True)
    e = jnp.exp(scores - m)
    att = e * pl.reciprocal(jnp.sum(e, axis=-1, keepdims=True), approx=True)
    att_last_ref[...] = att[B - 1:B, :]                                  # att_weight[-1]

    # context = bmm(att.unsqueeze(1), enc).squeeze(1)
    ctx = jnp.sum(att[:, :, None] * enc, axis=1)                         # (B, H)

    # ---- one stacked-LSTM time step (layers unrolled, gates in f32) ------------------
    def lstm_update(gates, c_prev, layer):
        Hh = hidden_size
        i = jax.nn.sigmoid(gates[:, 0:Hh])
        f = jax.nn.sigmoid(gates[:, Hh:2 * Hh])
        g = jnp.tanh(gates[:, 2 * Hh:3 * Hh])
        o = jax.nn.sigmoid(gates[:, 3 * Hh:4 * Hh])
        c_new = f * c_prev + i * g
        h_new = o * jnp.tanh(c_new)
        h_out_ref[layer] = h_new
        c_out_ref[layer] = c_new
        return h_new

    # F.relu(cat(embedded, context)) fused; the concat is replaced by a split weight.
    emb_r = jnp.maximum(emb_ref[...], 0.0).astype(bf16)                  # (B, E)
    ctx_r = jnp.maximum(ctx, 0.0).astype(bf16)                           # (B, H)
    gates0 = (jnp.dot(emb_r, w_ih0e_t[...], preferred_element_type=f32)
              + jnp.dot(ctx_r, w_ih0c_t[...], preferred_element_type=f32)
              + jnp.dot(hid_ref[0].astype(bf16), w_hh0_t[...],
                        preferred_element_type=f32)
              + b_l0[...])                                               # (B, 4H)
    x = lstm_update(gates0, cell_ref[0], 0)

    for l in range(1, n_layers):
        w_ih_t, w_hh_t, b_l = layer_refs[3 * (l - 1):3 * l]
        gates = (jnp.dot(x.astype(bf16), w_ih_t[...], preferred_element_type=f32)
                 + jnp.dot(hid_ref[l].astype(bf16), w_hh_t[...],
                           preferred_element_type=f32)
                 + b_l[...])
        x = lstm_update(gates, cell_ref[l], l)

    # ---- output projection (vocab padded to a multiple of 128 -> lane-dense store) ---
    logits_ref[...] = (jnp.dot(x.astype(bf16), w_out_t[...],
                               preferred_element_type=f32) + b_out[...])


# ----------------------------------------------------------------------------
# One-time parameter preparation (layout, folding, bf16 cast, vocab padding)
# ----------------------------------------------------------------------------
def prepare_decoder(params, n_layers, batch_size):
    bf16 = jnp.bfloat16
    H = params['w_hid'].shape[0]
    E = params['emb'].shape[1]
    V = params['w_out'].shape[0]
    Vp = ((V + 127) // 128) * 128

    w_out_p = jnp.pad(params['w_out'], ((0, Vp - V), (0, 0)))
    b_out_p = jnp.pad(params['b_out'], (0, Vp - V))

    prep = {
        'n_layers': n_layers, 'H': H, 'E': E, 'V': V, 'Vp': Vp,
        'emb': params['emb'],                                            # f32 gather table
        'w_hid_t': params['w_hid'].T.astype(bf16),                       # (H, H)
        'w_enc_bt': jnp.broadcast_to(params['w_enc'].T.astype(bf16),
                                     (batch_size, H, H)),                # (B, H, H)
        'b_att': (params['b_hid'] + params['b_enc'])[None, :],           # (1, H) folded
        'tanw': params['tan_w'][:, :, 0],                                # (B, H)
        'w_ih0e_t': params['w_ih'][0][:, :E].T.astype(bf16),             # (E, 4H) embedded part
        'w_ih0c_t': params['w_ih'][0][:, E:].T.astype(bf16),             # (H, 4H) context part
        'w_hh0_t': params['w_hh'][0].T.astype(bf16),                     # (H, 4H)
        'b_l0': (params['b_ih'][0] + params['b_hh'][0])[None, :],        # (1, 4H) folded
        'w_ih_t': [params['w_ih'][l].T.astype(bf16) for l in range(1, n_layers)],
        'w_hh_t': [params['w_hh'][l].T.astype(bf16) for l in range(1, n_layers)],
        'b_l': [(params['b_ih'][l] + params['b_hh'][l])[None, :] for l in range(1, n_layers)],
        'w_out_t': w_out_p.T.astype(bf16),                               # (H, Vp)
        'b_out_p': b_out_p[None, :],                                     # (1, Vp)
    }
    return prep


# ----------------------------------------------------------------------------
# Per-token decode step (single fused pallas_call; glue = embedding gather only)
# ----------------------------------------------------------------------------
def decode_step(prep, enc_bf, input_ids, hidden, cell):
    nl, H, V, Vp = prep['n_layers'], prep['H'], prep['V'], prep['Vp']
    B, S, _ = enc_bf.shape

    # Embedding lookup; dropout is eval-mode identity.
    # TODO(synk): dropout is treated as eval-mode identity (no RNG masking).
    emb = prep['emb'][input_ids[:, 0]]                                   # (B, E)

    inputs = [emb, hidden, cell, enc_bf,
              prep['w_hid_t'], prep['w_enc_bt'], prep['b_att'], prep['tanw'],
              prep['w_ih0e_t'], prep['w_ih0c_t'], prep['w_hh0_t'], prep['b_l0']]
    for l in range(nl - 1):
        inputs += [prep['w_ih_t'][l], prep['w_hh_t'][l], prep['b_l'][l]]
    inputs += [prep['w_out_t'], prep['b_out_p']]

    kern = functools.partial(fused_decoder_kernel, n_layers=nl, hidden_size=H)

    logits_p, h_out, c_out, att_last = pl.pallas_call(
        kern,
        out_shape=(jax.ShapeDtypeStruct((B, Vp), jnp.float32),
                   jax.ShapeDtypeStruct((nl, B, H), jnp.float32),
                   jax.ShapeDtypeStruct((nl, B, H), jnp.float32),
                   jax.ShapeDtypeStruct((1, S), jnp.float32)),
        in_specs=[_vmem()] * len(inputs),
        out_specs=(_vmem(), _vmem(), _vmem(), _vmem()),
    )(*inputs)

    logits = logits_p[:, :V]                                             # drop vocab padding
    return logits[:, None, :], h_out, c_out, att_last[0]


def attention_decoder_forward(params, input_ids, hidden, cell, encoder_outputs, n_layers):
    """Convenience wrapper matching the PyTorch module's forward signature."""
    B = hidden.shape[1]
    prep = prepare_decoder(params, n_layers, B)
    enc_bf = jnp.transpose(encoder_outputs, (1, 0, 2))                   # once per sequence
    return decode_step(prep, enc_bf, input_ids, hidden, cell)


# ----------------------------------------------------------------------------
# Pure-JAX reference (mirrors the PyTorch forward exactly) for verification
# ----------------------------------------------------------------------------
def reference_forward(params, input_ids, hidden, cell, encoder_outputs, n_layers):
    embedded = params['emb'][input_ids]
    hid_last = hidden[n_layers - 1]
    hid_proj = hid_last @ params['w_hid'].T + params['b_hid']
    enc_proj = jnp.einsum('sbh,gh->sbg', encoder_outputs, params['w_enc']) + params['b_enc']
    tan = jnp.tanh(hid_proj[None, :, :] + enc_proj)                      # (S, B, H)
    tan = jnp.transpose(tan, (1, 0, 2))                                  # (B, S, H)
    scores = jnp.einsum('bsh,bhk->bsk', tan, params['tan_w'])[:, :, 0]
    att = jax.nn.softmax(scores, axis=1)
    attention = att[-1]
    enc_bf = jnp.transpose(encoder_outputs, (1, 0, 2))
    context = jnp.einsum('bs,bsh->bh', att, enc_bf)[:, None, :]
    new_input = jax.nn.relu(jnp.concatenate([embedded, context], axis=2))
    x = new_input[:, 0, :]
    H = hidden.shape[-1]
    hs, cs = [], []
    for l in range(n_layers):
        gates = (x @ params['w_ih'][l].T + params['b_ih'][l]
                 + hidden[l] @ params['w_hh'][l].T + params['b_hh'][l])
        i = jax.nn.sigmoid(gates[:, 0:H])
        f = jax.nn.sigmoid(gates[:, H:2 * H])
        g = jnp.tanh(gates[:, 2 * H:3 * H])
        o = jax.nn.sigmoid(gates[:, 3 * H:4 * H])
        c_l = f * cell[l] + i * g
        h_l = o * jnp.tanh(c_l)
        hs.append(h_l)
        cs.append(c_l)
        x = h_l
    out = x @ params['w_out'].T + params['b_out']
    return out[:, None, :], jnp.stack(hs), jnp.stack(cs), attention


if __name__ == "__main__":
    # Small shapes consistent with the module: batch=2, hidden=32, emb=16,
    # vocab/output=10, n_layers=2, encoder seq len=8, single decode step.
    B, H, E, V, S, NL = 2, 32, 16, 10, 8, 2

    def rnd(k, shape, scale=0.1):
        return (scale * jax.random.normal(k, shape)).astype(jnp.float32)

    ks = jax.random.split(jax.random.PRNGKey(0), 16)
    params = {
        'emb':   rnd(ks[0], (V, E), 1.0),
        'w_hid': rnd(ks[1], (H, H)),  'b_hid': rnd(ks[2], (H,)),
        'w_enc': rnd(ks[3], (H, H)),  'b_enc': rnd(ks[4], (H,)),
        'tan_w': rnd(ks[5], (B, H, 1), 1.0),
        'w_out': rnd(ks[6], (V, H)),  'b_out': rnd(ks[7], (V,)),
        'w_ih': [rnd(ks[8], (4 * H, E + H)), rnd(ks[9], (4 * H, H))],
        'w_hh': [rnd(ks[10], (4 * H, H)),    rnd(ks[11], (4 * H, H))],
        'b_ih': [rnd(ks[12], (4 * H,)),      rnd(ks[13], (4 * H,))],
        'b_hh': [rnd(ks[14], (4 * H,)),      rnd(ks[15], (4 * H,))],
    }

    kin = jax.random.split(jax.random.PRNGKey(1), 4)
    input_ids = jax.random.randint(kin[0], (B, 1), 0, V)                 # (B, 1) token ids
    hidden = rnd(kin[1], (NL, B, H), 1.0)
    cell = rnd(kin[2], (NL, B, H), 1.0)
    encoder_outputs = rnd(kin[3], (S, B, H), 1.0)

    # One-time prep (layout/folding/bf16/padding) and per-sequence encoder transpose.
    prep = prepare_decoder(params, NL, B)
    enc_bf = jnp.transpose(encoder_outputs, (1, 0, 2))                   # (B, S, H)

    step = jax.jit(lambda e, ids, h, c: decode_step(prep, e, ids, h, c))
    outs = step(enc_bf, input_ids, hidden, cell)
    jax.block_until_ready(outs)

    refs = reference_forward(params, input_ids, hidden, cell, encoder_outputs, NL)
    for got, want in zip(outs, refs):
        np.testing.assert_allclose(np.asarray(got), np.asarray(want), atol=2e-2, rtol=2e-2)

    print("KERNEL_OK")
</pallas_src>

<mosaic_0001>
module attributes {stable_mosaic.version = 11 : i64} {
  func.func @fused_decoder_kernel(%arg0: memref<2x16xf32, #tpu.memory_space<vmem>>, %arg1: memref<2x2x32xf32, #tpu.memory_space<vmem>>, %arg2: memref<2x2x32xf32, #tpu.memory_space<vmem>>, %arg3: memref<2x8x32xf32, #tpu.memory_space<vmem>>, %arg4: memref<32x32xbf16, #tpu.memory_space<vmem>>, %arg5: memref<2x32x32xbf16, #tpu.memory_space<vmem>>, %arg6: memref<1x32xf32, #tpu.memory_space<vmem>>, %arg7: memref<2x32xf32, #tpu.memory_space<vmem>>, %arg8: memref<16x128xbf16, #tpu.memory_space<vmem>>, %arg9: memref<32x128xbf16, #tpu.memory_space<vmem>>, %arg10: memref<32x128xbf16, #tpu.memory_space<vmem>>, %arg11: memref<1x128xf32, #tpu.memory_space<vmem>>, %arg12: memref<32x128xbf16, #tpu.memory_space<vmem>>, %arg13: memref<32x128xbf16, #tpu.memory_space<vmem>>, %arg14: memref<1x128xf32, #tpu.memory_space<vmem>>, %arg15: memref<32x128xbf16, #tpu.memory_space<vmem>>, %arg16: memref<1x128xf32, #tpu.memory_space<vmem>>, %arg17: memref<2x128xf32, #tpu.memory_space<vmem>>, %arg18: memref<2x2x32xf32, #tpu.memory_space<vmem>>, %arg19: memref<2x2x32xf32, #tpu.memory_space<vmem>>, %arg20: memref<1x8xf32, #tpu.memory_space<vmem>>) attributes {dimension_semantics = [], scalar_prefetch = 0 : i64, scratch_operands = 0 : i64, tpu.core_type = #tpu.core_type<tc>} {
    %c1 = arith.constant 1 : index
    %c0 = arith.constant 0 : index
    %c0_0 = arith.constant 0 : index
    %0 = vector.load %arg1[%c1, %c0, %c0_0] : memref<2x2x32xf32, #tpu.memory_space<vmem>>, vector<1x2x32xf32>
    %1 = vector.shape_cast %0 : vector<1x2x32xf32> to vector<2x32xf32>
    %c0_1 = arith.constant 0 : index
    %c0_2 = arith.constant 0 : index
    %c0_3 = arith.constant 0 : index
    %2 = vector.load %arg3[%c0_1, %c0_2, %c0_3] : memref<2x8x32xf32, #tpu.memory_space<vmem>>, vector<2x8x32xf32>
    %3 = arith.truncf %1 : vector<2x32xf32> to vector<2x32xbf16>
    %c0_4 = arith.constant 0 : index
    %c0_5 = arith.constant 0 : index
    %4 = vector.load %arg4[%c0_4, %c0_5] : memref<32x32xbf16, #tpu.memory_space<vmem>>, vector<32x32xbf16>
    %cst = arith.constant dense<0.000000e+00> : vector<2x32xf32>
    %5 = tpu.matmul %3, %4, %cst {dimension_numbers = #tpu.dot_dimension_numbers<[1], [0], [0], [1], [0, 0, 1, 1], [], []>} : vector<2x32xbf16>, vector<32x32xbf16>, vector<2x32xf32> -> vector<2x32xf32>
    %c0_6 = arith.constant 0 : index
    %c0_7 = arith.constant 0 : index
    %6 = vector.load %arg6[%c0_6, %c0_7] : memref<1x32xf32, #tpu.memory_space<vmem>>, vector<1x32xf32>
    %7 = vector.broadcast %6 : vector<1x32xf32> to vector<2x32xf32>
    %8 = arith.addf %5, %7 : vector<2x32xf32>
    %9 = arith.truncf %2 : vector<2x8x32xf32> to vector<2x8x32xbf16>
    %c0_8 = arith.constant 0 : index
    %c0_9 = arith.constant 0 : index
    %c0_10 = arith.constant 0 : index
    %10 = vector.load %arg5[%c0_8, %c0_9, %c0_10] : memref<2x32x32xbf16, #tpu.memory_space<vmem>>, vector<2x32x32xbf16>
    "tpu.trace_start"() <{level = 10 : i32, message = "bsh,bhg->bsg"}> : () -> ()
    %cst_11 = arith.constant dense<0.000000e+00> : vector<2x8x32xf32>
    %11 = tpu.matmul %9, %10, %cst_11 {dimension_numbers = #tpu.dot_dimension_numbers<[2], [1], [1], [2], [0, 0, 0, 1, 1, 2], [0], [0]>} : vector<2x8x32xbf16>, vector<2x32x32xbf16>, vector<2x8x32xf32> -> vector<2x8x32xf32>
    "tpu.trace_stop"() : () -> ()
    %12 = vector.shape_cast %8 : vector<2x32xf32> to vector<2x1x32xf32>
    %13 = vector.broadcast %12 : vector<2x1x32xf32> to vector<2x8x32xf32>
    %14 = arith.addf %13, %11 : vector<2x8x32xf32>
    %15 = math.tanh %14 : vector<2x8x32xf32>
    %c0_12 = arith.constant 0 : index
    %c0_13 = arith.constant 0 : index
    %16 = vector.load %arg7[%c0_12, %c0_13] : memref<2x32xf32, #tpu.memory_space<vmem>>, vector<2x32xf32>
    %17 = vector.shape_cast %16 : vector<2x32xf32> to vector<2x1x32xf32>
    %18 = vector.broadcast %17 : vector<2x1x32xf32> to vector<2x8x32xf32>
    %19 = arith.mulf %15, %18 : vector<2x8x32xf32>
    %cst_14 = arith.constant dense<0.000000e+00> : vector<2x8xf32>
    %20 = vector.multi_reduction <add>, %19, %cst_14 [2] : vector<2x8x32xf32> to vector<2x8xf32>
    %cst_15 = arith.constant dense<0xFF800000> : vector<2xf32>
    %21 = vector.multi_reduction <maximumf>, %20, %cst_15 [1] : vector<2x8xf32> to vector<2xf32>
    %22 = vector.shape_cast %21 : vector<2xf32> to vector<2x1xf32>
    %23 = vector.broadcast %22 : vector<2x1xf32> to vector<2x8xf32>
    %24 = arith.subf %20, %23 : vector<2x8xf32>
    %25 = math.exp %24 : vector<2x8xf32>
    %cst_16 = arith.constant dense<0.000000e+00> : vector<2xf32>
    %26 = vector.multi_reduction <add>, %25, %cst_16 [1] : vector<2x8xf32> to vector<2xf32>
    %27 = vector.shape_cast %26 : vector<2xf32> to vector<2x1xf32>
    %28 = tpu.reciprocal %27 {approx = true} : vector<2x1xf32> -> vector<2x1xf32>
    %29 = vector.broadcast %28 : vector<2x1xf32> to vector<2x8xf32>
    %30 = arith.mulf %25, %29 : vector<2x8xf32>
    %31 = vector.extract_strided_slice %30 {offsets = [1, 0], sizes = [1, 8], strides = [1, 1]} : vector<2x8xf32> to vector<1x8xf32>
    %c0_17 = arith.constant 0 : index
    %c0_18 = arith.constant 0 : index
    %32 = vector.load %arg20[%c0_17, %c0_18] : memref<1x8xf32, #tpu.memory_space<vmem>>, vector<1x8xf32>
    tpu.vector_store %arg20[%c0_17, %c0_18], %31 {strides = array<i32>} : memref<1x8xf32, #tpu.memory_space<vmem>>, vector<1x8xf32>,
    %33 = vector.shape_cast %30 : vector<2x8xf32> to vector<2x8x1xf32>
    %34 = vector.broadcast %33 : vector<2x8x1xf32> to vector<2x8x32xf32>
    %35 = arith.mulf %34, %2 : vector<2x8x32xf32>
    %cst_19 = arith.constant dense<0.000000e+00> : vector<2x32xf32>
    %36 = vector.multi_reduction <add>, %35, %cst_19 [1] : vector<2x8x32xf32> to vector<2x32xf32>
    %c0_20 = arith.constant 0 : index
    %c0_21 = arith.constant 0 : index
    %37 = vector.load %arg0[%c0_20, %c0_21] : memref<2x16xf32, #tpu.memory_space<vmem>>, vector<2x16xf32>
    %cst_22 = arith.constant 0.000000e+00 : f32
    %38 = vector.broadcast %cst_22 : f32 to vector<2x16xf32>
    %39 = arith.maximumf %37, %38 : vector<2x16xf32>
    %40 = arith.truncf %39 : vector<2x16xf32> to vector<2x16xbf16>
    %cst_23 = arith.constant 0.000000e+00 : f32
    %41 = vector.broadcast %cst_23 : f32 to vector<2x32xf32>
    %42 = arith.maximumf %36, %41 : vector<2x32xf32>
    %43 = arith.truncf %42 : vector<2x32xf32> to vector<2x32xbf16>
    %c0_24 = arith.constant 0 : index
    %c0_25 = arith.constant 0 : index
    %44 = vector.load %arg8[%c0_24, %c0_25] : memref<16x128xbf16, #tpu.memory_space<vmem>>, vector<16x128xbf16>
    %cst_26 = arith.constant dense<0.000000e+00> : vector<2x128xf32>
    %45 = tpu.matmul %40, %44, %cst_26 {dimension_numbers = #tpu.dot_dimension_numbers<[1], [0], [0], [1], [0, 0, 1, 1], [], []>} : vector<2x16xbf16>, vector<16x128xbf16>, vector<2x128xf32> -> vector<2x128xf32>
    %c0_27 = arith.constant 0 : index
    %c0_28 = arith.constant 0 : index
    %46 = vector.load %arg9[%c0_27, %c0_28] : memref<32x128xbf16, #tpu.memory_space<vmem>>, vector<32x128xbf16>
    %cst_29 = arith.constant dense<0.000000e+00> : vector<2x128xf32>
    %47 = tpu.matmul %43, %46, %cst_29 {dimension_numbers = #tpu.dot_dimension_numbers<[1], [0], [0], [1], [0, 0, 1, 1], [], []>} : vector<2x32xbf16>, vector<32x128xbf16>, vector<2x128xf32> -> vector<2x128xf32>
    %48 = arith.addf %45, %47 : vector<2x128xf32>
    %c0_30 = arith.constant 0 : index
    %c0_31 = arith.constant 0 : index
    %c0_32 = arith.constant 0 : index
    %49 = vector.load %arg1[%c0_30, %c0_31, %c0_32] : memref<2x2x32xf32, #tpu.memory_space<vmem>>, vector<1x2x32xf32>
    %50 = vector.shape_cast %49 : vector<1x2x32xf32> to vector<2x32xf32>
    %51 = arith.truncf %50 : vector<2x32xf32> to vector<2x32xbf16>
    %c0_33 = arith.constant 0 : index
    %c0_34 = arith.constant 0 : index
    %52 = vector.load %arg10[%c0_33, %c0_34] : memref<32x128xbf16, #tpu.memory_space<vmem>>, vector<32x128xbf16>
    %cst_35 = arith.constant dense<0.000000e+00> : vector<2x128xf32>
    %53 = tpu.matmul %51, %52, %cst_35 {dimension_numbers = #tpu.dot_dimension_numbers<[1], [0], [0], [1], [0, 0, 1, 1], [], []>} : vector<2x32xbf16>, vector<32x128xbf16>, vector<2x128xf32> -> vector<2x128xf32>
    %54 = arith.addf %48, %53 : vector<2x128xf32>
    %c0_36 = arith.constant 0 : index
    %c0_37 = arith.constant 0 : index
    %55 = vector.load %arg11[%c0_36, %c0_37] : memref<1x128xf32, #tpu.memory_space<vmem>>, vector<1x128xf32>
    %56 = vector.broadcast %55 : vector<1x128xf32> to vector<2x128xf32>
    %57 = arith.addf %54, %56 : vector<2x128xf32>
    %c0_38 = arith.constant 0 : index
    %c0_39 = arith.constant 0 : index
    %c0_40 = arith.constant 0 : index
    %58 = vector.load %arg2[%c0_38, %c0_39, %c0_40] : memref<2x2x32xf32, #tpu.memory_space<vmem>>, vector<1x2x32xf32>
    %59 = vector.shape_cast %58 : vector<1x2x32xf32> to vector<2x32xf32>
    %60 = vector.extract_strided_slice %57 {offsets = [0, 0], sizes = [2, 32], strides = [1, 1]} : vector<2x128xf32> to vector<2x32xf32>
    %61 = arith.negf %60 : vector<2x32xf32>
    %62 = math.exp %61 : vector<2x32xf32>
    %cst_41 = arith.constant 1.000000e+00 : f32
    %63 = vector.broadcast %cst_41 : f32 to vector<2x32xf32>
    %64 = arith.addf %63, %62 : vector<2x32xf32>
    %65 = arith.divf %63, %64 : vector<2x32xf32>
    %66 = vector.extract_strided_slice %57 {offsets = [0, 32], sizes = [2, 32], strides = [1, 1]} : vector<2x128xf32> to vector<2x32xf32>
    %67 = arith.negf %66 : vector<2x32xf32>
    %68 = math.exp %67 : vector<2x32xf32>
    %cst_42 = arith.constant 1.000000e+00 : f32
    %69 = vector.broadcast %cst_42 : f32 to vector<2x32xf32>
    %70 = arith.addf %69, %68 : vector<2x32xf32>
    %71 = arith.divf %69, %70 : vector<2x32xf32>
    %72 = vector.extract_strided_slice %57 {offsets = [0, 64], sizes = [2, 32], strides = [1, 1]} : vector<2x128xf32> to vector<2x32xf32>
    %73 = math.tanh %72 : vector<2x32xf32>
    %74 = vector.extract_strided_slice %57 {offsets = [0, 96], sizes = [2, 32], strides = [1, 1]} : vector<2x128xf32> to vector<2x32xf32>
    %75 = arith.negf %74 : vector<2x32xf32>
    %76 = math.exp %75 : vector<2x32xf32>
    %cst_43 = arith.constant 1.000000e+00 : f32
    %77 = vector.broadcast %cst_43 : f32 to vector<2x32xf32>
    %78 = arith.addf %77, %76 : vector<2x32xf32>
    %79 = arith.divf %77, %78 : vector<2x32xf32>
    %80 = arith.mulf %71, %59 : vector<2x32xf32>
    %81 = arith.mulf %65, %73 : vector<2x32xf32>
    %82 = arith.addf %80, %81 : vector<2x32xf32>
    %83 = math.tanh %82 : vector<2x32xf32>
    %84 = arith.mulf %79, %83 : vector<2x32xf32>
    %c0_44 = arith.constant 0 : index
    %c0_45 = arith.constant 0 : index
    %c0_46 = arith.constant 0 : index
    %85 = vector.load %arg18[%c0_44, %c0_45, %c0_46] : memref<2x2x32xf32, #tpu.memory_space<vmem>>, vector<1x2x32xf32>
    %86 = vector.shape_cast %85 : vector<1x2x32xf32> to vector<2x32xf32>
    %87 = vector.shape_cast %84 : vector<2x32xf32> to vector<1x2x32xf32>
    tpu.vector_store %arg18[%c0_44, %c0_45, %c0_46], %87 {strides = array<i32>} : memref<2x2x32xf32, #tpu.memory_space<vmem>>, vector<1x2x32xf32>,
    %c0_47 = arith.constant 0 : index
    %c0_48 = arith.constant 0 : index
    %c0_49 = arith.constant 0 : index
    %88 = vector.load %arg19[%c0_47, %c0_48, %c0_49] : memref<2x2x32xf32, #tpu.memory_space<vmem>>, vector<1x2x32xf32>
    %89 = vector.shape_cast %88 : vector<1x2x32xf32> to vector<2x32xf32>
    %90 = vector.shape_cast %82 : vector<2x32xf32> to vector<1x2x32xf32>
    tpu.vector_store %arg19[%c0_47, %c0_48, %c0_49], %90 {strides = array<i32>} : memref<2x2x32xf32, #tpu.memory_space<vmem>>, vector<1x2x32xf32>,
    %91 = arith.truncf %84 : vector<2x32xf32> to vector<2x32xbf16>
    %c0_50 = arith.constant 0 : index
    %c0_51 = arith.constant 0 : index
    %92 = vector.load %arg12[%c0_50, %c0_51] : memref<32x128xbf16, #tpu.memory_space<vmem>>, vector<32x128xbf16>
    %cst_52 = arith.constant dense<0.000000e+00> : vector<2x128xf32>
    %93 = tpu.matmul %91, %92, %cst_52 {dimension_numbers = #tpu.dot_dimension_numbers<[1], [0], [0], [1], [0, 0, 1, 1], [], []>} : vector<2x32xbf16>, vector<32x128xbf16>, vector<2x128xf32> -> vector<2x128xf32>
    %c1_53 = arith.constant 1 : index
    %c0_54 = arith.constant 0 : index
    %c0_55 = arith.constant 0 : index
    %94 = vector.load %arg1[%c1_53, %c0_54, %c0_55] : memref<2x2x32xf32, #tpu.memory_space<vmem>>, vector<1x2x32xf32>
    %95 = vector.shape_cast %94 : vector<1x2x32xf32> to vector<2x32xf32>
    %96 = arith.truncf %95 : vector<2x32xf32> to vector<2x32xbf16>
    %c0_56 = arith.constant 0 : index
    %c0_57 = arith.constant 0 : index
    %97 = vector.load %arg13[%c0_56, %c0_57] : memref<32x128xbf16, #tpu.memory_space<vmem>>, vector<32x128xbf16>
    %cst_58 = arith.constant dense<0.000000e+00> : vector<2x128xf32>
    %98 = tpu.matmul %96, %97, %cst_58 {dimension_numbers = #tpu.dot_dimension_numbers<[1], [0], [0], [1], [0, 0, 1, 1], [], []>} : vector<2x32xbf16>, vector<32x128xbf16>, vector<2x128xf32> -> vector<2x128xf32>
    %99 = arith.addf %93, %98 : vector<2x128xf32>
    %c0_59 = arith.constant 0 : index
    %c0_60 = arith.constant 0 : index
    %100 = vector.load %arg14[%c0_59, %c0_60] : memref<1x128xf32, #tpu.memory_space<vmem>>, vector<1x128xf32>
    %101 = vector.broadcast %100 : vector<1x128xf32> to vector<2x128xf32>
    %102 = arith.addf %99, %101 : vector<2x128xf32>
    %c1_61 = arith.constant 1 : index
    %c0_62 = arith.constant 0 : index
    %c0_63 = arith.constant 0 : index
    %103 = vector.load %arg2[%c1_61, %c0_62, %c0_63] : memref<2x2x32xf32, #tpu.memory_space<vmem>>, vector<1x2x32xf32>
    %104 = vector.shape_cast %103 : vector<1x2x32xf32> to vector<2x32xf32>
    %105 = vector.extract_strided_slice %102 {offsets = [0, 0], sizes = [2, 32], strides = [1, 1]} : vector<2x128xf32> to vector<2x32xf32>
    %106 = arith.negf %105 : vector<2x32xf32>
    %107 = math.exp %106 : vector<2x32xf32>
    %cst_64 = arith.constant 1.000000e+00 : f32
    %108 = vector.broadcast %cst_64 : f32 to vector<2x32xf32>
    %109 = arith.addf %108, %107 : vector<2x32xf32>
    %110 = arith.divf %108, %109 : vector<2x32xf32>
    %111 = vector.extract_strided_slice %102 {offsets = [0, 32], sizes = [2, 32], strides = [1, 1]} : vector<2x128xf32> to vector<2x32xf32>
    %112 = arith.negf %111 : vector<2x32xf32>
    %113 = math.exp %112 : vector<2x32xf32>
    %cst_65 = arith.constant 1.000000e+00 : f32
    %114 = vector.broadcast %cst_65 : f32 to vector<2x32xf32>
    %115 = arith.addf %114, %113 : vector<2x32xf32>
    %116 = arith.divf %114, %115 : vector<2x32xf32>
    %117 = vector.extract_strided_slice %102 {offsets = [0, 64], sizes = [2, 32], strides = [1, 1]} : vector<2x128xf32> to vector<2x32xf32>
    %118 = math.tanh %117 : vector<2x32xf32>
    %119 = vector.extract_strided_slice %102 {offsets = [0, 96], sizes = [2, 32], strides = [1, 1]} : vector<2x128xf32> to vector<2x32xf32>
    %120 = arith.negf %119 : vector<2x32xf32>
    %121 = math.exp %120 : vector<2x32xf32>
    %cst_66 = arith.constant 1.000000e+00 : f32
    %122 = vector.broadcast %cst_66 : f32 to vector<2x32xf32>
    %123 = arith.addf %122, %121 : vector<2x32xf32>
    %124 = arith.divf %122, %123 : vector<2x32xf32>
    %125 = arith.mulf %116, %104 : vector<2x32xf32>
    %126 = arith.mulf %110, %118 : vector<2x32xf32>
    %127 = arith.addf %125, %126 : vector<2x32xf32>
    %128 = math.tanh %127 : vector<2x32xf32>
    %129 = arith.mulf %124, %128 : vector<2x32xf32>
    %c1_67 = arith.constant 1 : index
    %c0_68 = arith.constant 0 : index
    %c0_69 = arith.constant 0 : index
    %130 = vector.load %arg18[%c1_67, %c0_68, %c0_69] : memref<2x2x32xf32, #tpu.memory_space<vmem>>, vector<1x2x32xf32>
    %131 = vector.shape_cast %130 : vector<1x2x32xf32> to vector<2x32xf32>
    %132 = vector.shape_cast %129 : vector<2x32xf32> to vector<1x2x32xf32>
    tpu.vector_store %arg18[%c1_67, %c0_68, %c0_69], %132 {strides = array<i32>} : memref<2x2x32xf32, #tpu.memory_space<vmem>>, vector<1x2x32xf32>,
    %c1_70 = arith.constant 1 : index
    %c0_71 = arith.constant 0 : index
    %c0_72 = arith.constant 0 : index
    %133 = vector.load %arg19[%c1_70, %c0_71, %c0_72] : memref<2x2x32xf32, #tpu.memory_space<vmem>>, vector<1x2x32xf32>
    %134 = vector.shape_cast %133 : vector<1x2x32xf32> to vector<2x32xf32>
    %135 = vector.shape_cast %127 : vector<2x32xf32> to vector<1x2x32xf32>
    tpu.vector_store %arg19[%c1_70, %c0_71, %c0_72], %135 {strides = array<i32>} : memref<2x2x32xf32, #tpu.memory_space<vmem>>, vector<1x2x32xf32>,
    %136 = arith.truncf %129 : vector<2x32xf32> to vector<2x32xbf16>
    %c0_73 = arith.constant 0 : index
    %c0_74 = arith.constant 0 : index
    %137 = vector.load %arg15[%c0_73, %c0_74] : memref<32x128xbf16, #tpu.memory_space<vmem>>, vector<32x128xbf16>
    %cst_75 = arith.constant dense<0.000000e+00> : vector<2x128xf32>
    %138 = tpu.matmul %136, %137, %cst_75 {dimension_numbers = #tpu.dot_dimension_numbers<[1], [0], [0], [1], [0, 0, 1, 1], [], []>} : vector<2x32xbf16>, vector<32x128xbf16>, vector<2x128xf32> -> vector<2x128xf32>
    %c0_76 = arith.constant 0 : index
    %c0_77 = arith.constant 0 : index
    %139 = vector.load %arg16[%c0_76, %c0_77] : memref<1x128xf32, #tpu.memory_space<vmem>>, vector<1x128xf32>
    %140 = vector.broadcast %139 : vector<1x128xf32> to vector<2x128xf32>
    %141 = arith.addf %138, %140 : vector<2x128xf32>
    %c0_78 = arith.constant 0 : index
    %c0_79 = arith.constant 0 : index
    %142 = vector.load %arg17[%c0_78, %c0_79] : memref<2x128xf32, #tpu.memory_space<vmem>>, vector<2x128xf32>
    tpu.vector_store %arg17[%c0_78, %c0_79], %141 {strides = array<i32>} : memref<2x128xf32, #tpu.memory_space<vmem>>, vector<2x128xf32>,
    return
  }
}

</mosaic_0001>

<bundles_post_ra>
// kernel: _lambda_.1
= control target key start
LH: loop header
LB: loop body
LE: loop exit
PB: predicated region body
PF: predicated region fallthrough
CT: control target
= control target key end

     0   :  { %s2018_s0 = inlined_call_operand.vmem [shape: f32[2,16], index: 0, kind: input, shape index: {}]   ;;  %s2019_s1 = inlined_call_operand.hbm [shape: f32[2,2,32], index: 1, kind: input, shape index: {}]   ;;  %s2020_s2 = inlined_call_operand.hbm [shape: f32[2,2,32], index: 2, kind: input, shape index: {}]   ;;  %s2021_s3 = inlined_call_operand.hbm [shape: f32[2,8,32], index: 3, kind: input, shape index: {}]   ;;  %s2022_s4 = inlined_call_operand.hbm [shape: bf16[32,32], index: 4, kind: input, shape index: {}]   ;;  %s2023_s5 = inlined_call_operand.vmem [shape: bf16[2,32,32], index: 5, kind: input, shape index: {}]   ;;  %s2024_s6 = inlined_call_operand.hbm [shape: f32[1,32], index: 6, kind: input, shape index: {}]   ;;  %s2025_s7 = inlined_call_operand.hbm [shape: f32[2,32], index: 7, kind: input, shape index: {}]   ;;  %s2026_s8 = inlined_call_operand.hbm [shape: bf16[16,128], index: 8, kind: input, shape index: {}]   ;;  %s2027_s9 = inlined_call_operand.hbm [shape: bf16[32,128], index: 9, kind: input, shape index: {}]   ;;  %s2028_s10 = inlined_call_operand.hbm [shape: bf16[32,128], index: 10, kind: input, shape index: {}]   ;;  %s2029_s11 = inlined_call_operand.hbm [shape: f32[1,128], index: 11, kind: input, shape index: {}]   ;;  %s2030_s12 = inlined_call_operand.hbm [shape: bf16[32,128], index: 12, kind: input, shape index: {}]   ;;  %s2031_s13 = inlined_call_operand.hbm [shape: bf16[32,128], index: 13, kind: input, shape index: {}]   ;;  %s2032_s14 = inlined_call_operand.vmem [shape: f32[1,128], index: 14, kind: input, shape index: {}]   ;;  %s2033_s15 = inlined_call_operand.vmem [shape: bf16[32,128], index: 15, kind: input, shape index: {}]   ;;  %s2034_s16 = inlined_call_operand.vmem [shape: f32[1,128], index: 16, kind: input, shape index: {}]   ;;  %s2035_s17 = inlined_call_operand.hbm [shape: f32[2,128], index: 17, kind: output, shape index: {0}]   ;;  %s2036_s18 = inlined_call_operand.hbm [shape: f32[2,2,32], index: 18, kind: output, shape index: {1}]   ;;  %s2037_s19 = inlined_call_operand.hbm [shape: f32[2,2,32], index: 19, kind: output, shape index: {2}]   ;;  %s2038_s20 = inlined_call_operand.hbm [shape: f32[1,8], index: 20, kind: output, shape index: {3}]  }
   0x1   :  { %2041 = sst [smem:[#allocation38_spill]] %s2018_s0 }
   0x2   :  { %2042 = sst [smem:[#allocation39_spill]] %s2019_s1 }
   0x3   :  { %2043 = sst [smem:[#allocation40_spill]] %s2020_s2 }
   0x4   :  { %2044 = sst [smem:[#allocation41_spill]] %s2021_s3 }
   0x5   :  { %2045 = sst [smem:[#allocation42_spill]] %s2022_s4 }
   0x6   :  { %26 = vsyncpa [#allocation3], 0 }
   0x7   :  { %27 = vsyncpa [#allocation6], 0 }
   0x8   :  { %28 = vsyncpa [#allocation9], 0 }
   0x9   :  { %29 = vsyncpa [#allocation12], 0 }
   0xa   :  { %30 = vsyncpa [#allocation15], 0 }
   0xb   :  { %31 = vsyncpa [#allocation18], 0 }
   0xc   :  { %32 = vsyncpa [#allocation21], 0 }
   0xd   :  { %33 = vsyncpa [#allocation4], 0 }
   0xe   :  { %34 = vsyncpa [#allocation24], 0 }
   0xf   :  { %35 = vsyncpa [#allocation27], 0  ;;  %s1682_s1 = smov [#allocation5]   ;;  %s1683_s23 = smov [#allocation8]  }
  0x10   :  { %s55_s22 = sshll.u32 %s1682_s1, 4  ;;  %s79_s24 = sshll.u32 %s1683_s23, 4  ;;  %s56_s22 = int_to_ptr.vmem [resolvable:$true] %s55_s22  ;;  %s80_s24 = int_to_ptr.vmem [resolvable:$true] %s79_s24 }
  0x11   :  { %s1350_s2 = scalar_lea.vmem %s56_s22, 64  ;;  %p1355_p1 = scmp.lt.s32.totalorder %s56_s22, %s56_s22 }
  0x12   :  { %p1351_p0 = scmp.ne.s32.totalorder %s56_s22, %s1350_s2  ;;  %p1356_p2 = scmp.lt.s32.totalorder %s1350_s2, %s1350_s2 }
  0x14   :  { %p1357_p3 = por %p1356_p2, %p1355_p1 }
  0x16   :  { %p1358_p4 = pnand %p1357_p3, %p1351_p0 }
  0x18   :  { %1361 = shalt.err (!%p1358_p4)
}
  0x19   :  { %s2039_s25 = smov 32   ;;  %s1685_s3 = smov 2  }
  0x1a   :  { %s2046_s28 = sld [smem:[#allocation40_spill]]  ;;  %s1370_s4 = scalar_lea.vmem %s80_s24, 256 }
  0x1b   :  { %p1371_p5 = scmp.ne.s32.totalorder %s80_s24, %s1370_s4  ;;  %p1375_p6 = scmp.lt.s32.totalorder %s80_s24, %s80_s24 }
  0x1c   :  { %p1376_p7 = scmp.lt.s32.totalorder %s1370_s4, %s1370_s4 }
  0x1e   :  { %p1377_p8 = por %p1376_p7, %p1375_p6 }
  0x20   :  { %61 = dma.hbm_to_vmem [thread:$0]  %s2046_s28, 64, %s56_s22, [#allocation6], %s2039_s25, %s2039_s25, %s1685_s3  }
  0x21   :  { %p1378_p9 = pnand %p1377_p8, %p1371_p5 }
  0x23   :  { %1381 = shalt.err (!%p1378_p9)
}
  0x24   :  { %s1686_s29 = smov 64   ;;  %s1687_s30 = smov 4  }
  0x25   :  { %s2047_s1 = sld [smem:[#allocation42_spill]]  ;;  %s1688_s23 = smov [#allocation11]  }
  0x26   :  { %s104_s2 = sshll.u32 %s1688_s23, 4  ;;  %s1689_s26 = smov [#allocation14]   ;;  %s105_s2 = int_to_ptr.vmem [resolvable:$true] %s104_s2 }
  0x27   :  { %s125_s22 = sshll.u32 %s1689_s26, 4  ;;  %s1390_s27 = scalar_lea.vmem %s105_s2, 32  ;;  %s126_s22 = int_to_ptr.vmem [resolvable:$true] %s125_s22 }
  0x28   :  { %p1391_p10 = scmp.ne.s32.totalorder %s105_s2, %s1390_s27  ;;  %p1395_p11 = scmp.lt.s32.totalorder %s105_s2, %s105_s2 }
  0x29   :  { %p1396_p12 = scmp.lt.s32.totalorder %s1390_s27, %s1390_s27 }
  0x2b   :  { %85 = dma.hbm_to_vmem [thread:$0]  %s2047_s1, 256, %s80_s24, [#allocation9], %s1686_s29, %s1686_s29, %s1687_s30  }
  0x2c   :  { %p1397_p13 = por %p1396_p12, %p1395_p11 }
  0x2e   :  { %p1398_p0 = pnand %p1397_p13, %p1391_p10 }
  0x30   :  { %1401 = shalt.err (!%p1398_p0)
}
  0x31   :  { %107 = dma.hbm_to_vmem [thread:$0]  %s2025_s7, 32, %s105_s2, [#allocation12]  }
  0x32   :  { %s1410_s25 = scalar_lea.vmem %s126_s22, 256  ;;  %p1415_p2 = scmp.lt.s32.totalorder %s126_s22, %s126_s22 }
  0x33   :  { %p1411_p1 = scmp.ne.s32.totalorder %s126_s22, %s1410_s25  ;;  %p1416_p3 = scmp.lt.s32.totalorder %s1410_s25, %s1410_s25 }
  0x35   :  { %p1417_p4 = por %p1416_p3, %p1415_p2 }
  0x37   :  { %p1418_p5 = pnand %p1417_p4, %p1411_p1 }
  0x39   :  { %1421 = shalt.err (!%p1418_p5)
}
  0x3a   :  { %131 = dma.hbm_to_vmem [thread:$0]  %s2027_s9, 256, %s126_s22, [#allocation15], %s1686_s29, %s1686_s29, %s1687_s30  }
  0x3b   :  { %s1690_s21 = smov [#allocation17]   ;;  %s1691_s23 = smov [#allocation2]  }
  0x3c   :  { %s150_s1 = sshll.u32 %s1690_s21, 4  ;;  %s43_s26 = sshll.u32 %s1691_s23, 4  ;;  %s151_s1 = int_to_ptr.vmem [resolvable:$true] %s150_s1  ;;  %s44_s26 = int_to_ptr.vmem [resolvable:$true] %s43_s26 }
  0x3d   :  { %s1430_s7 = scalar_lea.vmem %s151_s1, 16  ;;  %s1434_s2 = scalar_lea.vmem %s151_s1, 32 }
  0x3e   :  { %p1431_p6 = scmp.ne.s32.totalorder %s151_s1, %s1430_s7  ;;  %p1435_p7 = scmp.lt.s32.totalorder %s151_s1, %s151_s1 }
  0x3f   :  { %p1436_p8 = scmp.lt.s32.totalorder %s1434_s2, %s1430_s7 }
  0x41   :  { %p1437_p9 = por %p1436_p8, %p1435_p7 }
  0x43   :  { %p1438_p10 = pnand %p1437_p9, %p1431_p6 }
  0x45   :  { %1441 = shalt.err (!%p1438_p10)
}
  0x46   :  { %153 = dma.hbm_to_vmem [thread:$0]  %s2029_s11, 16, %s151_s1, [#allocation18]  }
  0x47   :  { %s1450_s28 = scalar_lea.vmem %s44_s26, 64  ;;  %p1455_p12 = scmp.lt.s32.totalorder %s44_s26, %s44_s26 }
  0x48   :  { %p1451_p11 = scmp.ne.s32.totalorder %s44_s26, %s1450_s28  ;;  %p1456_p13 = scmp.lt.s32.totalorder %s1450_s28, %s1450_s28 }
  0x4a   :  { %p1457_p0 = por %p1456_p13, %p1455_p12 }
  0x4c   :  { %p1458_p1 = pnand %p1457_p0, %p1451_p11 }
  0x4e   :  { %1461 = shalt.err (!%p1458_p1)
}
  0x4f   :  { %s2048_s9 = smov 32   ;;  %s2049_s24 = sld [smem:[#allocation39_spill]] }
  0x50   :  { %s1692_s0 = smov [#allocation7]  }
  0x51   :  { %s67_s21 = sshll.u32 %s1692_s0, 4  ;;  %s68_s21 = int_to_ptr.vmem [resolvable:$true] %s67_s21 }
  0x52   :  { %s1470_s23 = scalar_lea.vmem %s68_s21, 256  ;;  %p1475_p3 = scmp.lt.s32.totalorder %s68_s21, %s68_s21 }
  0x53   :  { %p1471_p2 = scmp.ne.s32.totalorder %s68_s21, %s1470_s23  ;;  %p1476_p4 = scmp.lt.s32.totalorder %s1470_s23, %s1470_s23 }
  0x55   :  { %49 = dma.hbm_to_vmem [thread:$0]  %s2049_s24, 64, %s44_s26, [#allocation3], %s2048_s9, %s2048_s9, %s1685_s3  }
  0x56   :  { %p1477_p5 = por %p1476_p4, %p1475_p3 }
  0x58   :  { %p1478_p6 = pnand %p1477_p5, %p1471_p2 }
  0x5a   :  { %1481 = shalt.err (!%p1478_p6)
}
  0x5b   :  { %s1693_s11 = smov 128   ;;  %s1694_s1 = smov 8  }
  0x5c   :  { %s2050_s25 = sld [smem:[#allocation41_spill]]  ;;  %s1695_s27 = smov [#allocation10]  }
  0x5d   :  { %s94_s28 = sshll.u32 %s1695_s27, 4  ;;  %s1696_s26 = smov [#allocation13]   ;;  %s95_s28 = int_to_ptr.vmem [resolvable:$true] %s94_s28 }
  0x5e   :  { %s113_s22 = sshll.u32 %s1696_s26, 4  ;;  %s1490_s4 = scalar_lea.vmem %s95_s28, 16  ;;  %s114_s22 = int_to_ptr.vmem [resolvable:$true] %s113_s22 }
  0x5f   :  { %p1491_p7 = scmp.ne.s32.totalorder %s95_s28, %s1490_s4  ;;  %s1494_s24 = scalar_lea.vmem %s95_s28, 32 }
  0x60   :  { %p1495_p8 = scmp.lt.s32.totalorder %s95_s28, %s95_s28  ;;  %p1496_p9 = scmp.lt.s32.totalorder %s1494_s24, %s1490_s4 }
  0x62   :  { %73 = dma.hbm_to_vmem [thread:$0]  %s2050_s25, 256, %s68_s21, [#allocation6], %s1693_s11, %s1693_s11, %s1694_s1  }
  0x63   :  { %p1497_p10 = por %p1496_p9, %p1495_p8 }
  0x65   :  { %p1498_p11 = pnand %p1497_p10, %p1491_p7 }
  0x67   :  { %1501 = shalt.err (!%p1498_p11)
}
  0x68   :  { %97 = dma.hbm_to_vmem [thread:$0]  %s2024_s6, 16, %s95_s28, [#allocation9]  }
  0x69   :  { %s1510_s7 = scalar_lea.vmem %s114_s22, 128  ;;  %p1515_p13 = scmp.lt.s32.totalorder %s114_s22, %s114_s22 }
  0x6a   :  { %p1511_p12 = scmp.ne.s32.totalorder %s114_s22, %s1510_s7  ;;  %p1516_p0 = scmp.lt.s32.totalorder %s1510_s7, %s1510_s7 }
  0x6c   :  { %p1517_p1 = por %p1516_p0, %p1515_p13 }
  0x6e   :  { %p1518_p2 = pnand %p1517_p1, %p1511_p12 }
  0x70   :  { %1521 = shalt.err (!%p1518_p2)
}
  0x71   :  { %119 = dma.hbm_to_vmem [thread:$0]  %s2026_s8, 128, %s114_s22, [#allocation12], %s1686_s29, %s1686_s29, %s1687_s30  }
  0x72   :  { %s1697_s1 = smov [#allocation16]   ;;  %s1698_s25 = smov [#allocation19]  }
  0x73   :  { %s137_s2 = sshll.u32 %s1697_s1, 4  ;;  %s159_s6 = sshll.u32 %s1698_s25, 4  ;;  %s138_s2 = int_to_ptr.vmem [resolvable:$true] %s137_s2  ;;  %s160_s6 = int_to_ptr.vmem [resolvable:$true] %s159_s6 }
  0x74   :  { %s1530_s27 = scalar_lea.vmem %s138_s2, 256  ;;  %p1535_p4 = scmp.lt.s32.totalorder %s138_s2, %s138_s2 }
  0x75   :  { %p1531_p3 = scmp.ne.s32.totalorder %s138_s2, %s1530_s27  ;;  %p1536_p5 = scmp.lt.s32.totalorder %s1530_s27, %s1530_s27 }
  0x77   :  { %p1537_p6 = por %p1536_p5, %p1535_p4 }
  0x79   :  { %p1538_p7 = pnand %p1537_p6, %p1531_p3 }
  0x7b   :  { %1541 = shalt.err (!%p1538_p7)
}
  0x7c   :  { %143 = dma.hbm_to_vmem [thread:$0]  %s2028_s10, 256, %s138_s2, [#allocation15], %s1686_s29, %s1686_s29, %s1687_s30  }
  0x7d   :  { %s1550_s8 = scalar_lea.vmem %s160_s6, 256  ;;  %p1555_p9 = scmp.lt.s32.totalorder %s160_s6, %s160_s6 }
  0x7e   :  { %p1551_p8 = scmp.ne.s32.totalorder %s160_s6, %s1550_s8  ;;  %p1556_p10 = scmp.lt.s32.totalorder %s1550_s8, %s1550_s8 }
  0x80   :  { %p1557_p11 = por %p1556_p10, %p1555_p9 }
  0x82   :  { %p1558_p12 = pnand %p1557_p11, %p1551_p8 }
  0x84   :  { %1561 = shalt.err (!%p1558_p12)
}
  0x85   :  { %165 = dma.hbm_to_vmem [thread:$0]  %s2030_s12, 256, %s160_s6, [#allocation18], %s1686_s29, %s1686_s29, %s1687_s30  }
  0x86   :  { %s1699_s24 = smov [#allocation20]  }
  0x87   :  { %s171_s0 = sshll.u32 %s1699_s24, 4  ;;  %s172_s0 = int_to_ptr.vmem [resolvable:$true] %s171_s0 }
  0x88   :  { %s1570_s23 = scalar_lea.vmem %s172_s0, 256  ;;  %p1575_p0 = scmp.lt.s32.totalorder %s172_s0, %s172_s0 }
  0x89   :  { %p1571_p13 = scmp.ne.s32.totalorder %s172_s0, %s1570_s23  ;;  %p1576_p1 = scmp.lt.s32.totalorder %s1570_s23, %s1570_s23 }
  0x8b   :  { %p1577_p2 = por %p1576_p1, %p1575_p0 }
  0x8d   :  { %p1578_p3 = pnand %p1577_p2, %p1571_p13 }
  0x8f   :  { %1581 = shalt.err (!%p1578_p3)
}
  0x90   :  { %177 = dma.hbm_to_vmem [thread:$0]  %s2031_s13, 256, %s172_s0, [#allocation21], %s1686_s29, %s1686_s29, %s1687_s30  }
  0x91   :  { %1662 = dma.done.wait [#allocation3], 64  }
  0x92   :  { %1663 = vsyncadd [#allocation3], 4294967232 }
  0x93   :  { %1664 = dma.done.wait [#allocation6], 320  }
  0x94   :  { %1665 = vsyncadd [#allocation6], 4294966976 }
  0x95   :  { %1666 = dma.done.wait [#allocation9], 272  }
  0x96   :  { %1667 = vsyncadd [#allocation9], 4294967024 }
  0x97   :  { %1668 = dma.done.wait [#allocation12], 160  }
  0x98   :  { %1669 = vsyncadd [#allocation12], 4294967136 }
  0x99   :  { %1670 = dma.done.wait [#allocation15], 512  }
  0x9a   :  { %1671 = vsyncadd [#allocation15], 4294966784 }
  0x9b   :  { %1672 = dma.done.wait [#allocation18], 272  }
  0x9c   :  { %1673 = vsyncadd [#allocation18], 4294967024 }
  0x9d   :  { %1674 = dma.done.wait [#allocation21], 256  }
  0x9e   :  { %1675 = vsyncadd [#allocation21], 4294967040  ;;  %v1700_v0 = vmov 0.0   ;;  %vm1701_vm0 = vmmov 0   ;;  %v1299_v1 = vld [vmem:[#allocation8 + $0x8] sm:$0xff]   ;;  %v1300_v2 = vld [vmem:[%s2023_s5 + $0x8] sm:$0xff]   ;;  %v417_v15 = vlaneseq }
  0x9f   :  { %1200 = vmatprep.subr.bf16.mxu0 %v1700_v0  ;;  %1208 = vmatprep.subr.bf16.mxu1 %v1700_v0  ;;  %v1301_v3 = vld [vmem:[#allocation8] sm:$0xff]   ;;  %v1302_v4 = vld [vmem:[%s2023_s5] sm:$0xff]   ;;  %v1888_v7 = vld [vmem:[#allocation7] sm:$0xff]  ;;  %vm249_vm1 = vcmask 261120   ;;  %v1702_v13 = vmov 1966171168  }
  0xa0   :  { %1204 = vmatprep.mubr.msk.bf16.mxu0 %vm1701_vm0, %v1700_v0  ;;  %1212 = vmatprep.mubr.msk.bf16.mxu1 %vm1701_vm0, %v1700_v0  ;;  %v222_v5 = vld [vmem:[#allocation2 + $0x2] sm:$0x3]  ;;  %v1303_v8 = vld [vmem:[%s2023_s5 + $0x18] sm:$0xff]   ;;  %v293_v9 = vpack.c.bf16 %v1888_v7, %v1888_v7  ;;  %v1304_v10 = vld [vmem:[%s2023_s5 + $0x10] sm:$0xff]   ;;  %v415_v14 = vunpack.c.l.s4 %v1702_v13  ;;  %v1915_v17 = vshrl.u32 %v417_v15, 7  ;;  %v495_v54 = vand.u32 127, %v417_v15 }
  0xa1   :  { %1201 = vmatpush3.bf16.msra.mxu0 %v1299_v1  ;;  %1209 = vmatpush3.bf16.msra.mxu1 %v1300_v2  ;;  %v225_v6 = vpack.c.bf16 %v222_v5, %v222_v5  ;;  %v1899_v11 = vld [vmem:[#allocation7 + $0x8] sm:$0xff]  ;;  %v1141_v18 = vld [vmem:[#allocation10] ss:$0 sm:$0xff]  ;;  %vm504_vm2 = vcmask 1041409   ;;  %vm507_vm3 = vcmask 58368   ;;  %v1703_v62 = vmov 0  }
  0xa2   :  { %1202 = vmatprep.subr.bf16.mxu0 %v1700_v0  ;;  %1210 = vmatprep.subr.bf16.mxu1 %v1700_v0  ;;  %v294_v12 = vpack.c.bf16 %v1899_v11, %v1899_v11  ;;  %v416_v16 = vunpack.c.0.s8 %v415_v14  ;;  %v1919_v25 = vsub.s32 0, %v1915_v17  ;;  %v1151_v41 = vld.sshfl [vmem:[#allocation11] sm:$0x11 pattern:$0x75316420]  ;;  %v1928_v56 = vsub.s32 %v495_v54, %v1915_v17  ;;  %s2051_s27 = sld [smem:[#allocation38_spill]] }
  0xa3   :  { %v459_v43 = vcombine.high %v1151_v41, %v1151_v41  ;;  %1298 = vset.pattern.permute.xlu0 %v1703_v62  ;;  %1297 = vset.pattern.permute.xlu1 %v1703_v62  ;;  %v518_v63 = vsub.s32 1, %v1915_v17  ;;  %vm676_vm4 = vcmask 130048   ;;  %vm572_vm5 = vcmask 57344   ;;  %s1704_s24 = smov 96  }
  0xa4   :  { %v419_v19 = vsub.s32 %v416_v16, %v1915_v17  ;;  %vm823_vm6 = vcmask 254976  }
  0xa5   :  { %1203 = vmatpush3.bf16.msra.mxu0 %v1301_v3  ;;  %1211 = vmatpush3.bf16.msra.mxu1 %v1302_v4 }
  0xa6   :  { %1216 = vmatprep.subr.bf16.mxu0 %v1700_v0  ;;  %1224 = vmatprep.subr.bf16.mxu1 %v1700_v0  ;;  %v466_v44 = vrot.slane %v1151_v41, %v419_v19  ;;  %v473_v45 = vrot.slane %v459_v43, %v419_v19 }
  0xa8   :  { %1205 = vmatmul.mubr.msk.bf16.vlgmr.msra.gmra.mxu0 %vm249_vm1, %v225_v6  ;;  %1213 = vmatmul.mubr.msk.bf16.vlgmr.msra.gmra.mxu1 %vm249_vm1, %v293_v9  ;;  %v477_v46 = vrot.slane %v466_v44, %v1919_v25  ;;  %v481_v47 = vrot.slane %v473_v45, %v1919_v25 }
  0xa9   :  { %1217 = vmatpush3.bf16.msra.mxu0 %v1303_v8  ;;  %1220 = vmatprep.mubr.msk.bf16.mxu0 %vm1701_vm0, %v1700_v0 }
  0xaa   :  { %1218 = vmatprep.subr.bf16.mxu0 %v1700_v0  ;;  %1228 = vmatprep.mubr.msk.bf16.mxu1 %vm1701_vm0, %v1700_v0 }
  0xad   :  { %1219 = vmatpush3.bf16.msra.mxu0 %v1304_v10 }
  0xae   :  { %1232 = vmatprep.subr.bf16.mxu0 %v1700_v0 }
  0xb0   :  { %1221 = vmatmul.mubr.msk.bf16.vlgmr.msra.gmra.mxu0 %vm249_vm1, %v294_v12 }
  0xb1   :  { %1234 = vmatprep.mubr.msk.bf16.mxu0 %vm1701_vm0, %v1700_v0 }
 0x168   :  { %v287_v20 = vpop.f32.mrf.mxu0  ;;  %v352_v22 = vpop.f32.mrf.mxu1 }
 0x169   :  { %v288_v21 = vadd.f32 %v1141_v18, %v287_v20 }
 0x16a   :  { %v1206_v23 = vpop.f32.mrf.mxu0  ;;  %v1214_v26 = vpop.f32.mrf.mxu1 }
 0x16b   :  { %v420_v24 = vrot.slane %v288_v21, %v419_v19  ;;  %v1306_v26 = vld [vmem:[#allocation14] sm:$0xff]  }
 0x16c   :  { %v290_v27 = vpop.f32.mrf.mxu0  ;;  %v355_v30 = vpop.f32.mrf.mxu1 }
 0x16d   :  { %v421_v28 = vcombine.high %v420_v24, %v420_v24  ;;  %v428_v29 = vrot.slane %v420_v24, %v419_v19  ;;  %v1305_v24 = vld [vmem:[#allocation14 + $0x8] sm:$0xff]   ;;  %v1307_v27 = vld [vmem:[#allocation13] sm:$0xff]  }
 0x16e   :  { %v1207_v31 = vpop.f32.mrf.mxu0  ;;  %v1215_v33 = vpop.f32.mrf.mxu1  ;;  %1225 = vmatpush3.bf16.msra.mxu1 %v1305_v24  ;;  %1233 = vmatpush3.bf16.msra.mxu0 %v1307_v27  ;;  %v1310_v27 = vld [vmem:[#allocation20 + $0x8] sm:$0xff]  }
 0x16f   :  { %v439_v32 = vrot.slane %v428_v29, %v1919_v25  ;;  %v435_v34 = vrot.slane %v421_v28, %v419_v19  ;;  %1226 = vmatprep.subr.bf16.mxu1 %v1700_v0  ;;  %v596_v28 = vld [vmem:[%s2051_s27] sm:$0x3]  ;;  %1246 = vmatprep.subr.bf16.mxu0 %v1700_v0 }
 0x170   :  { %v407_v35 = vpop.f32.mrf.mxu0  ;;  %v597_v29 = vmax.f32 %v596_v28, 0.0  ;;  %v1312_v28 = vld [vmem:[#allocation19 + $0x8] sm:$0xff]  }
 0x171   :  { %v446_v36 = vadd.f32 %v439_v32, %v352_v22  ;;  %v443_v37 = vrot.slane %v435_v34, %v1919_v25 }
 0x172   :  { %v1222_v38 = vpop.f32.mrf.mxu0  ;;  %1227 = vmatpush3.bf16.msra.mxu1 %v1306_v26  ;;  %v598_v30 = vpack.c.bf16 %v597_v29, %v597_v29  ;;  %v1311_v29 = vld [vmem:[#allocation20] sm:$0xff]  }
 0x173   :  { %1316 = vtanh.f32 %v446_v36  ;;  %v447_v39 = vadd.f32 %v443_v37, %v407_v35  ;;  %1238 = vmatprep.subr.bf16.mxu1 %v1700_v0 }
 0x174   :  { %v410_v40 = vpop.f32.mrf.mxu0  ;;  %1235 = vmatmul.mubr.msk.bf16.vlgmr.msra.gmra.mxu0 %vm676_vm4, %v598_v30  ;;  %v835_v30 = vld [vmem:[#allocation2 + $0x2] sm:$0x3] }
 0x175   :  { %1318 = vtanh.f32 %v447_v39  ;;  %1250 = vmatprep.mubr.msk.bf16.mxu0 %vm1701_vm0, %v1700_v0  ;;  %1247 = vmatpush3.bf16.msra.mxu0 %v1310_v27 }
 0x176   :  { %v1223_v42 = vpop.f32.mrf.mxu0  ;;  %1248 = vmatprep.subr.bf16.mxu0 %v1700_v0 }
 0x179   :  { %1249 = vmatpush3.bf16.msra.mxu0 %v1311_v29 }
 0x17a   :  { %1262 = vmatprep.subr.bf16.mxu0 %v1700_v0 }
 0x180   :  { %v1317_v48 = vpop.eup %1316 }
 0x181   :  { %v484_v49 = vmul.f32 %v1317_v48, %v477_v46 }
 0x182   :  { %v1319_v50 = vpop.eup %1318 }
 0x183   :  { %v486_v51 = vsel %vm249_vm1, %v484_v49, 0.0  ;;  %v485_v52 = vmul.f32 %v1319_v50, %v481_v47 }
 0x184   :  { %487 = vadd.xlane.f32.xlu0 %v486_v51 }
 0x185   :  { %v489_v53 = vsel %vm249_vm1, %v485_v52, 0.0 }
 0x188   :  { %490 = vadd.xlane.f32.xlu0 %v489_v53 }
 0x20d   :  { %v488_v55 = vpop.xlane.xlu0 %487 }
 0x20e   :  { %v499_v58 = vrot.slane %v488_v55, %v1928_v56 }
 0x211   :  { %v491_v57 = vpop.xlane.xlu0 %490 }
 0x212   :  { %v503_v59 = vrot.slane %v491_v57, %v1928_v56 }
 0x214   :  { %v505_v60 = vsel %vm504_vm2, %v503_v59, %v499_v58  ;;  %v720_v58 = vld [vmem:[#allocation2] sm:$0x3] }
 0x215   :  { %v508_v61 = vsel %vm507_vm3, %v505_v60, -inf  ;;  %v721_v59 = vpack.c.bf16 %v720_v58, %v720_v58 }
 0x216   :  { %509 = vmax.xlane.f32.xlu1 %v508_v61 }
 0x234   :  { %v714_v60 = vpop.f32.mrf.mxu0 }
 0x236   :  { %v1236_v61 = vpop.f32.mrf.mxu0 }
 0x238   :  { %v717_v62 = vpop.f32.mrf.mxu0 }
 0x29f   :  { %v510_v1 = vpop.xlane.xlu1 %509 }
 0x2a0   :  { %v515_v2 = vrot.slane %v510_v1, %v1919_v25  ;;  %v519_v3 = vrot.slane %v510_v1, %v518_v63 }
 0x2a2   :  { %v522_v4 = vsub.f32 %v488_v55, %v515_v2  ;;  %v523_v5 = vsub.f32 %v491_v57, %v519_v3  ;;  %v1308_v55 = vld [vmem:[#allocation16 + $0x8] sm:$0xff]   ;;  %v1309_v57 = vld [vmem:[#allocation16] sm:$0xff]  }
 0x2a4   :  { %v524_v6 = vmul.f32 1.442695, %v522_v4  ;;  %v526_v8 = vmul.f32 1.442695, %v523_v5 }
 0x2a6   :  { %1320 = vpow2.f32 %v524_v6 }
 0x2a7   :  { %1322 = vpow2.f32 %v526_v8  ;;  %v1160_v8 = vld [vmem:[#allocation17] ss:$0 sm:$0xff] }
 0x2b3   :  { %v1321_v9 = vpop.eup %1320 }
 0x2b4   :  { %v1323_v10 = vpop.eup %1322  ;;  %531 = vperm.xlu1 %1297, %v1321_v9  }
 0x2b5   :  { %534 = vperm.xlu0 %1298, %v1323_v10  }
 0x32f   :  { %v532_v12 = vpop.permute.xlu1 %531 }
 0x330   :  { %v535_v13 = vpop.permute.xlu0 %534  ;;  %v539_v14 = vrot.slane %v532_v12, %v1928_v56 }
 0x331   :  { %v543_v15 = vrot.slane %v535_v13, %v1928_v56 }
 0x333   :  { %v544_v16 = vsel %vm504_vm2, %v543_v15, %v539_v14 }
 0x334   :  { %v546_v17 = vsel %vm507_vm3, %v544_v16, 0.0 }
 0x335   :  { %547 = vadd.xlane.f32.xlu1 %v546_v17 }
 0x3be   :  { %v548_v18 = vpop.xlane.xlu1 %547 }
 0x3bf   :  { %1324 = vrcp.f32 %v548_v18 }
 0x3cc   :  { %v1325_v19 = vpop.eup %1324 }
 0x3cd   :  { %v558_v20 = vrot.slane %v1325_v19, %v518_v63  ;;  %v554_v22 = vrot.slane %v1325_v19, %v1919_v25  ;;  %v790_v25 = vld [vmem:[#allocation5] sm:$0x3]  ;;  %v1237_v63 = vpop.f32.mrf.mxu0 }
 0x3cf   :  { %v562_v21 = vmul.f32 %v1323_v10, %v558_v20  ;;  %v561_v23 = vmul.f32 %v1321_v9, %v554_v22 }
 0x3d1   :  { %565 = vperm.xlu0 %1298, %v562_v21  }
 0x3d5   :  { %576 = vperm.xlu0 %1298, %v561_v23  }
 0x3d9   :  { %799 = vrot.lane.b32.xlu0 %v790_v25, %s2048_s9  ;;  %v1313_v25 = vld [vmem:[#allocation19] sm:$0xff]  }
 0x44c   :  { %v566_v31 = vpop.permute.xlu0 %565 }
 0x44d   :  { %v570_v32 = vrot.slane %v566_v31, %v1928_v56  ;;  %v581_v33 = vmul.f32 %v566_v31, %v1899_v11  ;;  %v836_v31 = vpack.c.bf16 %v835_v30, %v835_v30 }
 0x44f   :  { %v589_v34 = vsel %vm249_vm1, %v581_v33, 0.0  ;;  %573 = vst.msk [vmem:[#allocation26] sm:$0x1] %vm572_vm5, %v570_v32  ;;  %1251 = vmatmul.mubr.msk.bf16.vlgmr.msra.gmra.mxu0 %vm249_vm1, %v836_v31 }
 0x450   :  { %v590_v35 = vrot.slane %v589_v34, 4  ;;  %v577_v36 = vpop.permute.xlu0 %576  ;;  %1266 = vmatprep.mubr.msk.bf16.mxu0 %vm1701_vm0, %v1700_v0 }
 0x451   :  { %v580_v37 = vmul.f32 %v577_v36, %v1888_v7  ;;  %v963_v36 = vld [vmem:[#allocation5 + $0x2] sm:$0x3] }
 0x452   :  { %v591_v38 = vadd.f32 %v590_v35, %v589_v34 }
 0x453   :  { %v582_v39 = vsel %vm249_vm1, %v580_v37, 0.0 }
 0x454   :  { %v592_v40 = vrot.slane %v591_v38, 2  ;;  %v583_v41 = vrot.slane %v582_v39, 4  ;;  %v800_v22 = vpop.permute.xlu0 %799 }
 0x456   :  { %v593_v42 = vadd.f32 %v592_v40, %v591_v38  ;;  %v584_v43 = vadd.f32 %v583_v41, %v582_v39 }
 0x458   :  { %v594_v44 = vrot.slane %v593_v42, 1  ;;  %v585_v45 = vrot.slane %v584_v43, 2 }
 0x45a   :  { %v595_v46 = vadd.f32 %v594_v44, %v593_v42  ;;  %v586_v47 = vadd.f32 %v585_v45, %v584_v43  ;;  %v1168_v43 = vld [vmem:[%s2032_s14] ss:$0 sm:$0xff] }
 0x45c   :  { %v600_v48 = vmax.f32 %v595_v46, 0.0  ;;  %v587_v11 = vrot.slane %v586_v47, 1 }
 0x45e   :  { %v588_v49 = vadd.f32 %v587_v11, %v586_v47  ;;  %v602_v50 = vpack.c.bf16 %v600_v48, %v600_v48 }
 0x460   :  { %v599_v51 = vmax.f32 %v588_v49, 0.0  ;;  %v612_v53 = vunpack.c.l.b16 %v602_v50 }
 0x462   :  { %v601_v52 = vpack.c.bf16 %v599_v51, %v599_v51 }
 0x464   :  { %v611_v54 = vunpack.c.l.b16 %v601_v52 }
 0x466   :  { %v613_v7 = vsel %vm504_vm2, %v612_v53, %v611_v54 }
 0x467   :  { %v614_v56 = vpack.c.b16 %v613_v7, %v613_v7 }
 0x469   :  { %1229 = vmatmul.mubr.msk.bf16.vlgmr.msra.gmra.mxu1 %vm249_vm1, %v614_v56 }
 0x46a   :  { %1239 = vmatpush3.bf16.msra.mxu1 %v1308_v55  ;;  %1242 = vmatprep.mubr.msk.bf16.mxu1 %vm1701_vm0, %v1700_v0 }
 0x46b   :  { %1240 = vmatprep.subr.bf16.mxu1 %v1700_v0 }
 0x46e   :  { %1241 = vmatpush3.bf16.msra.mxu1 %v1309_v57 }
 0x46f   :  { %1254 = vmatprep.subr.bf16.mxu1 %v1700_v0 }
 0x471   :  { %1243 = vmatmul.mubr.msk.bf16.vlgmr.msra.gmra.mxu1 %vm249_vm1, %v721_v59  ;;  %v1314_v59 = vld [vmem:[%s2033_s15 + $0x8] sm:$0xff]  }
 0x472   :  { %1258 = vmatprep.mubr.msk.bf16.mxu1 %vm1701_vm0, %v1700_v0  ;;  %1255 = vmatpush3.bf16.msra.mxu1 %v1312_v28 }
 0x473   :  { %1256 = vmatprep.subr.bf16.mxu1 %v1700_v0  ;;  %1263 = vmatpush3.bf16.msra.mxu0 %v1314_v59 }
 0x474   :  { %1264 = vmatprep.subr.bf16.mxu0 %v1700_v0 }
 0x476   :  { %1257 = vmatpush3.bf16.msra.mxu1 %v1313_v25 }
 0x50f   :  { %v890_v37 = vpop.f32.mrf.mxu0 }
 0x511   :  { %v1252_v38 = vpop.f32.mrf.mxu0 }
 0x513   :  { %v893_v39 = vpop.f32.mrf.mxu0 }
 0x515   :  { %v1253_v40 = vpop.f32.mrf.mxu0 }
 0x529   :  { %v664_v1 = vpop.f32.mrf.mxu1 }
 0x52a   :  { %v715_v5 = vadd.f32 %v714_v60, %v664_v1  ;;  %v1315_v60 = vld [vmem:[%s2033_s15] sm:$0xff]   ;;  %s1705_s15 = smov [#allocation23]  }
 0x52b   :  { %v1230_v2 = vpop.f32.mrf.mxu1  ;;  %1265 = vmatpush3.bf16.msra.mxu0 %v1315_v60 }
 0x52d   :  { %v667_v3 = vpop.f32.mrf.mxu1 }
 0x52f   :  { %v1231_v4 = vpop.f32.mrf.mxu1 }
 0x531   :  { %v775_v6 = vpop.f32.mrf.mxu1 }
 0x532   :  { %v781_v9 = vadd.f32 %v775_v6, %v715_v5 }
 0x533   :  { %v1244_v10 = vpop.f32.mrf.mxu1 }
 0x534   :  { %v789_v12 = vadd.f32 %v1160_v8, %v781_v9 }
 0x535   :  { %v778_v13 = vpop.f32.mrf.mxu1 }
 0x536   :  { %1326 = vtanh.f32 %v789_v12  ;;  %v1161_v16 = vmul.f32 -1.442695, %v789_v12 }
 0x537   :  { %v1245_v14 = vpop.f32.mrf.mxu1 }
 0x538   :  { %1328 = vpow2.f32 %v1161_v16 }
 0x543   :  { %v1327_v15 = vpop.eup %1326 }
 0x544   :  { %804 = vrot.lane.b32.xlu1 %v1327_v15, %s1686_s29 }
 0x545   :  { %v1329_v17 = vpop.eup %1328 }
 0x546   :  { %v794_v18 = vadd.f32 1.0, %v1329_v17 }
 0x548   :  { %1330 = vrcp.f32 %v794_v18 }
 0x555   :  { %v1331_v19 = vpop.eup %1330 }
 0x556   :  { %v802_v23 = vmul.f32 %v1331_v19, %v800_v22 }
 0x5b6   :  { %v805_v20 = vpop.permute.xlu1 %804 }
 0x5b7   :  { %v807_v21 = vmul.f32 %v1331_v19, %v805_v20 }
 0x5b9   :  { %809 = vrot.lane.b32.xlu0 %v807_v21, %s2048_s9 }
 0x62b   :  { %v810_v24 = vpop.permute.xlu0 %809 }
 0x62c   :  { %v1966_v26 = vadd.f32 %v810_v24, %v802_v23 }
 0x62e   :  { %1332 = vtanh.f32 %v1966_v26 }
 0x63b   :  { %v1333_v32 = vpop.eup %1332 }
 0x63c   :  { %815 = vrot.lane.b32.xlu0 %v1333_v32, %s1686_s29 }
 0x6ae   :  { %v816_v33 = vpop.permute.xlu0 %815 }
 0x6af   :  { %v818_v34 = vmul.f32 %v1331_v19, %v816_v33 }
 0x6b1   :  { %v830_v35 = vpack.c.bf16 %v818_v34, %v818_v34 }
 0x6b3   :  { %897 = vrot.lane.b32.xlu0 %v830_v35, %s2048_s9 }
 0x6b7   :  { %972 = vrot.lane.b32.xlu0 %v963_v36, %s2048_s9 }
 0x725   :  { %v898_v41 = vpop.permute.xlu0 %897 }
 0x726   :  { %1259 = vmatmul.mubr.msk.bf16.vlgmr.msra.gmra.mxu1 %vm249_vm1, %v898_v41 }
 0x729   :  { %v973_v7 = vpop.permute.xlu0 %972 }
 0x7e6   :  { %v948_v42 = vpop.f32.mrf.mxu1 }
 0x7e7   :  { %v949_v44 = vadd.f32 %v948_v42, %v890_v37 }
 0x7e8   :  { %v1260_v45 = vpop.f32.mrf.mxu1 }
 0x7e9   :  { %v961_v46 = vadd.f32 %v1168_v43, %v949_v44 }
 0x7ea   :  { %v951_v47 = vpop.f32.mrf.mxu1 }
 0x7eb   :  { %1334 = vtanh.f32 %v961_v46  ;;  %v1169_v49 = vmul.f32 -1.442695, %v961_v46 }
 0x7ec   :  { %v1261_v48 = vpop.f32.mrf.mxu1 }
 0x7ed   :  { %1336 = vpow2.f32 %v1169_v49 }
 0x7f8   :  { %v1335_v11 = vpop.eup %1334 }
 0x7f9   :  { %977 = vrot.lane.b32.xlu1 %v1335_v11, %s1686_s29 }
 0x7fa   :  { %v1337_v50 = vpop.eup %1336 }
 0x7fb   :  { %v967_v51 = vadd.f32 1.0, %v1337_v50 }
 0x7fd   :  { %1338 = vrcp.f32 %v967_v51 }
 0x80a   :  { %v1339_v52 = vpop.eup %1338 }
 0x80b   :  { %v975_v55 = vmul.f32 %v1339_v52, %v973_v7 }
 0x86b   :  { %v978_v53 = vpop.permute.xlu1 %977 }
 0x86c   :  { %v980_v54 = vmul.f32 %v1339_v52, %v978_v53 }
 0x86e   :  { %982 = vrot.lane.b32.xlu1 %v980_v54, %s2048_s9 }
 0x8e0   :  { %v983_v56 = vpop.permute.xlu1 %982 }
 0x8e1   :  { %v985_v57 = vadd.f32 %v983_v56, %v975_v55 }
 0x8e3   :  { %1340 = vtanh.f32 %v985_v57 }
 0x8f0   :  { %v1341_v58 = vpop.eup %1340 }
 0x8f1   :  { %988 = vrot.lane.b32.xlu0 %v1341_v58, %s1686_s29  ;;  %s1090_s29 = sshll.u32 %s1705_s15, 4  ;;  %s1091_s29 = int_to_ptr.vmem [resolvable:$true] %s1090_s29 }
 0x8f2   :  { %s1582_s0 = scalar_lea.vmem %s1091_s29, 64  ;;  %p1587_p5 = scmp.lt.s32.totalorder %s1091_s29, %s1091_s29 }
 0x8f3   :  { %p1583_p4 = scmp.ne.s32.totalorder %s1091_s29, %s1582_s0  ;;  %p1588_p6 = scmp.lt.s32.totalorder %s1582_s0, %s1582_s0 }
 0x8f5   :  { %820 = vrot.lane.b32.xlu0 %v818_v34, %s2048_s9  ;;  %p1589_p7 = por %p1588_p6, %p1587_p5 }
 0x8f7   :  { %p1590_p8 = pnand %p1589_p7, %p1583_p4 }
 0x8f9   :  { %826 = vrot.lane.b32.xlu0 %v1966_v26, %s1704_s24 }
 0x963   :  { %v989_v61 = vpop.permute.xlu0 %988 }
 0x964   :  { %v991_v62 = vmul.f32 %v1339_v52, %v989_v61 }
 0x966   :  { %v1004_v63 = vpack.c.bf16 %v991_v62, %v991_v62 }
 0x967   :  { %v821_v1 = vpop.permute.xlu0 %820 }
 0x968   :  { %824 = vst.msk [vmem:[#allocation23] sm:$0x3] %vm823_vm6, %v821_v1  ;;  %1017 = vrot.lane.b32.xlu1 %v1004_v63, %s2048_s9 }
 0x96b   :  { %v827_v2 = vpop.permute.xlu0 %826 }
 0x96c   :  { %829 = vst.msk [vmem:[#allocation25] sm:$0x3] %vm823_vm6, %v827_v2  ;;  %993 = vrot.lane.b32.xlu1 %v991_v62, %s2048_s9 }
 0x970   :  { %999 = vrot.lane.b32.xlu1 %v985_v57, %s1704_s24 }
 0x9da   :  { %v1018_v0 = vpop.permute.xlu1 %1017 }
 0x9db   :  { %1267 = vmatmul.mubr.msk.bf16.vlgmr.msra.gmra.mxu0 %vm249_vm1, %v1018_v0 }
 0x9de   :  { %v994_v3 = vpop.permute.xlu1 %993 }
 0x9df   :  { %997 = vst.msk [vmem:[#allocation23 + $0x2] sm:$0x3] %vm823_vm6, %v994_v3 }
 0x9e2   :  { %v1000_v4 = vpop.permute.xlu1 %999 }
 0x9e3   :  { %1003 = vst.msk [vmem:[#allocation25 + $0x2] sm:$0x3] %vm823_vm6, %v1000_v4 }
 0x9e4   :  { %1593 = shalt.err (!%p1590_p8)
}
 0x9e5   :  { %1096 = dma.vmem_to_hbm [thread:$0]  %s1091_s29, 64, %s2036_s18, [#allocation24], %s2048_s9, %s2048_s9, %s1685_s3  }
 0x9e6   :  { %s1706_s7 = smov [#allocation25]   ;;  %s1707_s13 = smov [#allocation26]  }
 0x9e7   :  { %s1102_s12 = sshll.u32 %s1706_s7, 4  ;;  %s1115_s30 = sshll.u32 %s1707_s13, 4  ;;  %s1103_s12 = int_to_ptr.vmem [resolvable:$true] %s1102_s12  ;;  %s1116_s30 = int_to_ptr.vmem [resolvable:$true] %s1115_s30 }
 0x9e8   :  { %s1602_s21 = scalar_lea.vmem %s1103_s12, 64  ;;  %p1607_p10 = scmp.lt.s32.totalorder %s1103_s12, %s1103_s12 }
 0x9e9   :  { %p1603_p9 = scmp.ne.s32.totalorder %s1103_s12, %s1602_s21  ;;  %p1608_p11 = scmp.lt.s32.totalorder %s1602_s21, %s1602_s21 }
 0x9eb   :  { %p1609_p12 = por %p1608_p11, %p1607_p10 }
 0x9ed   :  { %p1610_p13 = pnand %p1609_p12, %p1603_p9 }
 0x9ef   :  { %1613 = shalt.err (!%p1610_p13)
}
 0x9f0   :  { %1108 = dma.vmem_to_hbm [thread:$0]  %s1103_s12, 64, %s2037_s19, [#allocation24], %s2048_s9, %s2048_s9, %s1685_s3  }
 0x9f1   :  { %s1622_s18 = scalar_lea.vmem %s1116_s30, 16  ;;  %s1626_s2 = scalar_lea.vmem %s1116_s30, 32 }
 0x9f2   :  { %p1623_p0 = scmp.ne.s32.totalorder %s1116_s30, %s1622_s18  ;;  %p1627_p1 = scmp.lt.s32.totalorder %s1116_s30, %s1116_s30 }
 0x9f3   :  { %p1628_p2 = scmp.lt.s32.totalorder %s1626_s2, %s1622_s18 }
 0x9f5   :  { %p1629_p3 = por %p1628_p2, %p1627_p1 }
 0x9f7   :  { %p1630_p4 = pnand %p1629_p3, %p1623_p0 }
 0x9f9   :  { %1633 = shalt.err (!%p1630_p4)
}
 0x9fa   :  { %1118 = dma.vmem_to_hbm [thread:$0]  %s1116_s30, 16, %s2038_s20, [#allocation27]   ;;  %v1170_v5 = vld [vmem:[%s2034_s16] ss:$0 sm:$0xff] }
 0x9fb   :  { %s1708_s28 = smov [#allocation22]  }
 0x9fc   :  { %s1081_s26 = sshll.u32 %s1708_s28, 4  ;;  %s1082_s26 = int_to_ptr.vmem [resolvable:$true] %s1081_s26 }
 0x9fd   :  { %s1642_s19 = scalar_lea.vmem %s1082_s26, 32  ;;  %p1647_p6 = scmp.lt.s32.totalorder %s1082_s26, %s1082_s26 }
 0x9fe   :  { %p1643_p5 = scmp.ne.s32.totalorder %s1082_s26, %s1642_s19  ;;  %p1648_p7 = scmp.lt.s32.totalorder %s1642_s19, %s1642_s19 }
 0xa00   :  { %p1649_p8 = por %p1648_p7, %p1647_p6 }
 0xa02   :  { %p1650_p9 = pnand %p1649_p8, %p1643_p5 }
 0xa9b   :  { %v1068_v6 = vpop.f32.mrf.mxu0 }
 0xa9c   :  { %v1069_v8 = vadd.f32 %v1170_v5, %v1068_v6 }
 0xa9d   :  { %v1268_v9 = vpop.f32.mrf.mxu0 }
 0xa9e   :  { %1074 = vst [vmem:[#allocation22] sm:$0x3] %v1069_v8 }
 0xa9f   :  { %v1071_v10 = vpop.f32.mrf.mxu0 }
 0xaa0   :  { %1653 = shalt.err (!%p1650_p9)
}
 0xaa1   :  { %1084 = dma.vmem_to_hbm [thread:$0]  %s1082_s26, 32, %s2035_s17, [#allocation4]   ;;  %v1269_v12 = vpop.f32.mrf.mxu0 }
 0xaa2   :  { %1676 = dma.done.wait [#allocation4], 32  }
 0xaa3   :  { %1677 = vsyncadd [#allocation4], 4294967264 }
 0xaa4   :  { %1678 = dma.done.wait [#allocation24], 128  }
 0xaa5   :  { %1679 = vsyncadd [#allocation24], 4294967168 }
 0xaa6   :  { %1680 = dma.done.wait [#allocation27], 16  }
 0xaa7   :  { %1681 = vsyncadd [#allocation27], 4294967280 }
 0xaa8   :  { %1131 = vsyncpa [#allocation3], 1 }
 0xaa9   :  { %1132 = vsyncpa [#allocation6], 1 }
 0xaaa   :  { %1133 = vsyncpa [#allocation9], 1 }
 0xaab   :  { %1134 = vsyncpa [#allocation12], 1 }
 0xaac   :  { %1135 = vsyncpa [#allocation15], 1 }
 0xaad   :  { %1136 = vsyncpa [#allocation18], 1 }
 0xaae   :  { %1137 = vsyncpa [#allocation21], 1 }
 0xaaf   :  { %1138 = vsyncpa [#allocation4], 1 }
 0xab0   :  { %1139 = vsyncpa [#allocation24], 1 }
 0xab1   :  { %1140 = vsyncpa [#allocation27], 1 }

</bundles_post_ra>
